<compile_context>
chip_gen: v7x
topology: tpu7x:2x2x1
jax: 0.10.0
libtpu: 0.0.40
codegen_flags: <defaults>
</compile_context>

<pallas_src>
import functools

import jax
import jax.numpy as jnp
import numpy as np
from jax import lax
from jax.experimental import pallas as pl
from jax.experimental.pallas import tpu as pltpu

INPUT_SIZE = 2
HIDDEN_SIZE = 64
OUTPUT_SIZE = 2

HP = 128          # per-gate padded width (one 128-lane tile); padded h/c width
OP = 128          # padded head-output lane width (lane-dense store)
TC_MAX = 256      # max time steps resident per grid step (chunk size)


def _lstm_chunk_kernel(T, Tc, Bp,
                       pre1_ref,                 # (Tc, Bp, 4*HP) precomputed x@W_ih1 + b1
                       whh1_ref,                 # (HP, 4*HP)   layer-0 recurrent weights
                       w2_ref,                   # (2*HP, 4*HP) fused [W_ih2 ; W_hh2]
                       b2_ref,                   # (1, 4*HP)
                       wlin_ref, blin_ref,       # (HP, OP), (1, OP) linear head
                       out_ref,                  # (Bp, OP)
                       h1_sc, c1_sc, h2_sc, c2_sc):
    chunk = pl.program_id(0)
    G = 4 * HP

    @pl.when(chunk == 0)
    def _():
        h1_sc[...] = jnp.zeros_like(h1_sc)
        c1_sc[...] = jnp.zeros_like(c1_sc)
        h2_sc[...] = jnp.zeros_like(h2_sc)
        c2_sc[...] = jnp.zeros_like(c2_sc)

    # Hoisted out of the serial loop (JAX does not CSE broadcasts).
    b2 = jnp.broadcast_to(b2_ref[...], (Bp, G))

    needs_mask = (T % Tc) != 0   # static: only the last (ragged) chunk needs masking

    def step(t, carry):
        h1, c1, h2, c2 = carry

        # ---- layer 0: x-projection was precomputed; only the recurrent matmul here.
        g1 = pre1_ref[t] + jnp.dot(h1, whh1_ref[...],
                                   preferred_element_type=jnp.float32)
        i1 = jax.nn.sigmoid(g1[:, 0 * HP:1 * HP])
        f1 = jax.nn.sigmoid(g1[:, 1 * HP:2 * HP])
        n1 = jnp.tanh(g1[:, 2 * HP:3 * HP])
        o1 = jax.nn.sigmoid(g1[:, 3 * HP:4 * HP])
        c1n = f1 * c1 + i1 * n1
        h1n = o1 * jnp.tanh(c1n)

        # ---- layer 1: single fused gate matmul over concat([h1, h2]).
        xh = jnp.concatenate([h1n, h2], axis=1)            # (Bp, 2*HP)
        g2 = jnp.dot(xh, w2_ref[...],
                     preferred_element_type=jnp.float32) + b2
        i2 = jax.nn.sigmoid(g2[:, 0 * HP:1 * HP])
        f2 = jax.nn.sigmoid(g2[:, 1 * HP:2 * HP])
        n2 = jnp.tanh(g2[:, 2 * HP:3 * HP])
        o2 = jax.nn.sigmoid(g2[:, 3 * HP:4 * HP])
        c2n = f2 * c2 + i2 * n2
        h2n = o2 * jnp.tanh(c2n)

        if needs_mask:
            valid = (chunk * Tc + t) < T
            h1n = jnp.where(valid, h1n, h1)
            c1n = jnp.where(valid, c1n, c1)
            h2n = jnp.where(valid, h2n, h2)
            c2n = jnp.where(valid, c2n, c2)
        return h1n, c1n, h2n, c2n

    carry0 = (h1_sc[...], c1_sc[...], h2_sc[...], c2_sc[...])
    h1, c1, h2, c2 = lax.fori_loop(0, Tc, step, carry0)
    h1_sc[...] = h1
    c1_sc[...] = c1
    h2_sc[...] = h2
    c2_sc[...] = c2

    # Linear head on the final hidden state (== linear(out[:, -1, :]) in PyTorch).
    @pl.when(chunk == pl.num_programs(0) - 1)
    def _():
        out_ref[...] = (jnp.dot(h2, wlin_ref[...],
                                preferred_element_type=jnp.float32)
                        + blin_ref[...]).astype(out_ref.dtype)


def _pad_gate_cols(w):
    """(K, 4H) -> (K, 4*HP): each of the i/f/g/o gates padded to a 128-lane tile."""
    H = HIDDEN_SIZE
    K = w.shape[0]
    out = jnp.zeros((K, 4 * HP), jnp.float32)
    for k in range(4):
        out = out.at[:, k * HP:k * HP + H].set(w[:, k * H:(k + 1) * H])
    return out


def _prepare_params(params):
    """Pad/fuse standard PyTorch-layout params into the kernel layout."""
    H, O = HIDDEN_SIZE, OUTPUT_SIZE
    # layer 0
    wih1_p = _pad_gate_cols(params["wih1"])                           # (I, 4*HP)
    b1_p = _pad_gate_cols(params["b1"])                               # (1, 4*HP)
    whh1_p = jnp.zeros((HP, 4 * HP), jnp.float32)
    whh1_p = whh1_p.at[:H, :].set(_pad_gate_cols(params["whh1"]))     # (HP, 4*HP)
    # layer 1: fused [W_ih2 ; W_hh2] on a (2*HP) input of concat([h1, h2])
    w2_p = jnp.zeros((2 * HP, 4 * HP), jnp.float32)
    w2_p = w2_p.at[:H, :].set(_pad_gate_cols(params["wih2"]))
    w2_p = w2_p.at[HP:HP + H, :].set(_pad_gate_cols(params["whh2"]))
    b2_p = _pad_gate_cols(params["b2"])                               # (1, 4*HP)
    # linear head
    wlin_p = jnp.zeros((HP, OP), jnp.float32).at[:H, :O].set(params["wlin"])
    blin_p = jnp.zeros((1, OP), jnp.float32).at[:, :O].set(params["blin"])
    return wih1_p, b1_p, whh1_p, w2_p, b2_p, wlin_p, blin_p


def position_lstm_pallas(x, params, *, tc=TC_MAX):
    """x: (B, T, I) float32 (batch_first, like PyTorch). Returns (B, O)."""
    B, T, I = x.shape
    if T == 0:
        raise ValueError("PositionLSTM requires a non-empty sequence (T > 0).")
    O = OUTPUT_SIZE

    Bp = max(8, ((B + 7) // 8) * 8)        # pad batch to f32 sublane tile
    Tc = min(tc, T)                        # time steps resident per grid step
    nchunks = (T + Tc - 1) // Tc
    Tpad = nchunks * Tc

    wih1_p, b1_p, whh1_p, w2_p, b2_p, wlin_p, blin_p = _prepare_params(params)

    # Pad batch, go time-major.
    x_p = jnp.pad(x.astype(jnp.float32), ((0, Bp - B), (0, 0), (0, 0)))
    x_tm = jnp.transpose(x_p, (1, 0, 2))                  # (T, Bp, I)

    # Hoisted layer-0 input projection (+ bias) for ALL time steps (no serial dep).
    pre1 = jnp.einsum('tbi,ig->tbg', x_tm, wih1_p) + b1_p[None]   # (T, Bp, 4*HP)
    if Tpad > T:
        pre1 = jnp.pad(pre1, ((0, Tpad - T), (0, 0), (0, 0)))

    kernel = functools.partial(_lstm_chunk_kernel, T, Tc, Bp)

    grid_spec = pltpu.PrefetchScalarGridSpec(
        num_scalar_prefetch=0,
        grid=(nchunks,),
        in_specs=[
            pl.BlockSpec((Tc, Bp, 4 * HP), lambda c: (c, 0, 0)),   # pre1 chunk
            pl.BlockSpec((HP, 4 * HP), lambda c: (0, 0)),          # W_hh layer 0
            pl.BlockSpec((2 * HP, 4 * HP), lambda c: (0, 0)),      # fused W layer 1
            pl.BlockSpec((1, 4 * HP), lambda c: (0, 0)),           # b layer 1
            pl.BlockSpec((HP, OP), lambda c: (0, 0)),              # linear W
            pl.BlockSpec((1, OP), lambda c: (0, 0)),               # linear b
        ],
        out_specs=pl.BlockSpec((Bp, OP), lambda c: (0, 0)),
        scratch_shapes=[pltpu.VMEM((Bp, HP), jnp.float32)] * 4,    # h1, c1, h2, c2
    )

    flops = 2 * T * Bp * (HP * 4 * HP + 2 * HP * 4 * HP) + 2 * Bp * HP * OP
    transcendentals = 10 * T * Bp * HP
    bytes_accessed = 4 * (pre1.size + whh1_p.size + w2_p.size + b2_p.size
                          + wlin_p.size + blin_p.size + Bp * OP)

    out = pl.pallas_call(
        kernel,
        out_shape=jax.ShapeDtypeStruct((Bp, OP), jnp.float32),
        grid_spec=grid_spec,
        compiler_params=pltpu.CompilerParams(
            dimension_semantics=("arbitrary",)),   # recurrence carried across chunks
        cost_estimate=pl.CostEstimate(flops=flops,
                                      transcendentals=transcendentals,
                                      bytes_accessed=bytes_accessed),
    )(pre1, whh1_p, w2_p, b2_p, wlin_p, blin_p)

    return out[:B, :O]


def init_params(key):
    """Deterministic params matching PyTorch LSTM/Linear shapes (pre-transposed).

    PyTorch stores W_ih as (4H, in) and W_hh as (4H, H); here they are already
    transposed so the math is x @ W. b_ih and b_hh are pre-summed into (1, 4H).
    """
    H, I, O = HIDDEN_SIZE, INPUT_SIZE, OUTPUT_SIZE
    k = 1.0 / np.sqrt(H)
    keys = jax.random.split(key, 10)
    u = lambda kk, shape: jax.random.uniform(kk, shape, jnp.float32, -k, k)
    return {
        "wih1": u(keys[0], (I, 4 * H)),
        "whh1": u(keys[1], (H, 4 * H)),
        "b1":   u(keys[2], (1, 4 * H)) + u(keys[3], (1, 4 * H)),
        "wih2": u(keys[4], (H, 4 * H)),
        "whh2": u(keys[5], (H, 4 * H)),
        "b2":   u(keys[6], (1, 4 * H)) + u(keys[7], (1, 4 * H)),
        "wlin": u(keys[8], (H, O)),
        "blin": u(keys[9], (1, O)),
    }


def position_lstm_reference(x, params):
    """Pure-JAX reference (lax.scan) for correctness checking."""
    B, T, I = x.shape
    H = HIDDEN_SIZE

    def cell(x_t, h, c, wih, whh, b):
        gates = x_t @ wih + h @ whh + b
        i = jax.nn.sigmoid(gates[:, 0 * H:1 * H])
        f = jax.nn.sigmoid(gates[:, 1 * H:2 * H])
        g = jnp.tanh(gates[:, 2 * H:3 * H])
        o = jax.nn.sigmoid(gates[:, 3 * H:4 * H])
        c_new = f * c + i * g
        return o * jnp.tanh(c_new), c_new

    def step(carry, x_t):
        h1, c1, h2, c2 = carry
        h1, c1 = cell(x_t, h1, c1, params["wih1"], params["whh1"], params["b1"])
        h2, c2 = cell(h1, h2, c2, params["wih2"], params["whh2"], params["b2"])
        return (h1, c1, h2, c2), h2

    z = jnp.zeros((B, H), jnp.float32)
    (_, _, h2, _), _ = lax.scan(step, (z, z, z, z), jnp.transpose(x, (1, 0, 2)))
    return h2 @ params["wlin"] + params["blin"]


if __name__ == "__main__":
    B, T = 2, 8
    key = jax.random.PRNGKey(0)
    k_param, k_x = jax.random.split(key)

    params = init_params(k_param)
    x = jax.random.normal(k_x, (B, T, INPUT_SIZE), jnp.float32)

    ref = position_lstm_reference(x, params)

    # Single-chunk path (T fits one resident chunk; no ragged masking).
    out = jax.block_until_ready(position_lstm_pallas(x, params))
    np.testing.assert_allclose(np.asarray(out), np.asarray(ref),
                               rtol=2e-3, atol=2e-3)

    # Multi-chunk path (state carried across chunks + ragged last-chunk masking).
    out_chunked = jax.block_until_ready(position_lstm_pallas(x, params, tc=3))
    np.testing.assert_allclose(np.asarray(out_chunked), np.asarray(ref),
                               rtol=2e-3, atol=2e-3)

    print("KERNEL_OK")
</pallas_src>

<mosaic_0001>
module attributes {stable_mosaic.version = 11 : i64} {
  func.func @_lstm_chunk_kernel(%arg0: i32, %arg1: memref<8x8x512xf32, #tpu.memory_space<vmem>>, %arg2: memref<128x512xf32, #tpu.memory_space<vmem>>, %arg3: memref<256x512xf32, #tpu.memory_space<vmem>>, %arg4: memref<1x512xf32, #tpu.memory_space<vmem>>, %arg5: memref<128x128xf32, #tpu.memory_space<vmem>>, %arg6: memref<1x128xf32, #tpu.memory_space<vmem>>, %arg7: memref<8x128xf32, #tpu.memory_space<vmem>>, %arg8: memref<8x128xf32, #tpu.memory_space<vmem>>, %arg9: memref<8x128xf32, #tpu.memory_space<vmem>>, %arg10: memref<8x128xf32, #tpu.memory_space<vmem>>, %arg11: memref<8x128xf32, #tpu.memory_space<vmem>>) attributes {dimension_semantics = [#tpu.dimension_semantics<arbitrary>], iteration_bounds = array<i64: 1>, scalar_prefetch = 0 : i64, scratch_operands = 4 : i64, tpu.core_type = #tpu.core_type<tc>, window_params = [{transform_indices = @transform_0, window_bounds = array<i64: 8, 8, 512>}, {pipeline_mode = #tpu.pipeline_mode<synchronous>, transform_indices = @transform_1, window_bounds = array<i64: 128, 512>}, {pipeline_mode = #tpu.pipeline_mode<synchronous>, transform_indices = @transform_2, window_bounds = array<i64: 256, 512>}, {pipeline_mode = #tpu.pipeline_mode<synchronous>, transform_indices = @transform_3, window_bounds = array<i64: 1, 512>}, {pipeline_mode = #tpu.pipeline_mode<synchronous>, transform_indices = @transform_4, window_bounds = array<i64: 128, 128>}, {pipeline_mode = #tpu.pipeline_mode<synchronous>, transform_indices = @transform_5, window_bounds = array<i64: 1, 128>}, {pipeline_mode = #tpu.pipeline_mode<synchronous>, transform_indices = @transform_6, window_bounds = array<i64: 8, 128>}]} {
    %c0_i32 = arith.constant 0 : i32
    %0 = arith.cmpi eq, %arg0, %c0_i32 : i32
    %1 = arith.extui %0 : i1 to i32
    %c0_i32_0 = arith.constant 0 : i32
    %2 = arith.cmpi ne, %1, %c0_i32_0 : i32
    scf.if %2 {
      %cst = arith.constant 0.000000e+00 : f32
      %19 = vector.broadcast %cst : f32 to vector<8x128xf32>
      %c0_22 = arith.constant 0 : index
      %c0_23 = arith.constant 0 : index
      %20 = vector.load %arg8[%c0_22, %c0_23] : memref<8x128xf32, #tpu.memory_space<vmem>>, vector<8x128xf32>
      tpu.vector_store %arg8[%c0_22, %c0_23], %19 {strides = array<i32>} : memref<8x128xf32, #tpu.memory_space<vmem>>, vector<8x128xf32>,
      %cst_24 = arith.constant 0.000000e+00 : f32
      %21 = vector.broadcast %cst_24 : f32 to vector<8x128xf32>
      %c0_25 = arith.constant 0 : index
      %c0_26 = arith.constant 0 : index
      %22 = vector.load %arg9[%c0_25, %c0_26] : memref<8x128xf32, #tpu.memory_space<vmem>>, vector<8x128xf32>
      tpu.vector_store %arg9[%c0_25, %c0_26], %21 {strides = array<i32>} : memref<8x128xf32, #tpu.memory_space<vmem>>, vector<8x128xf32>,
      %cst_27 = arith.constant 0.000000e+00 : f32
      %23 = vector.broadcast %cst_27 : f32 to vector<8x128xf32>
      %c0_28 = arith.constant 0 : index
      %c0_29 = arith.constant 0 : index
      %24 = vector.load %arg10[%c0_28, %c0_29] : memref<8x128xf32, #tpu.memory_space<vmem>>, vector<8x128xf32>
      tpu.vector_store %arg10[%c0_28, %c0_29], %23 {strides = array<i32>} : memref<8x128xf32, #tpu.memory_space<vmem>>, vector<8x128xf32>,
      %cst_30 = arith.constant 0.000000e+00 : f32
      %25 = vector.broadcast %cst_30 : f32 to vector<8x128xf32>
      %c0_31 = arith.constant 0 : index
      %c0_32 = arith.constant 0 : index
      %26 = vector.load %arg11[%c0_31, %c0_32] : memref<8x128xf32, #tpu.memory_space<vmem>>, vector<8x128xf32>
      tpu.vector_store %arg11[%c0_31, %c0_32], %25 {strides = array<i32>} : memref<8x128xf32, #tpu.memory_space<vmem>>, vector<8x128xf32>,
    } else {
    }
    %c0 = arith.constant 0 : index
    %c0_1 = arith.constant 0 : index
    %3 = vector.load %arg4[%c0, %c0_1] : memref<1x512xf32, #tpu.memory_space<vmem>>, vector<1x512xf32>
    %4 = vector.shape_cast %3 : vector<1x512xf32> to vector<1x512xf32>
    %5 = vector.broadcast %4 : vector<1x512xf32> to vector<8x512xf32>
    %c0_2 = arith.constant 0 : index
    %c0_3 = arith.constant 0 : index
    %6 = vector.load %arg8[%c0_2, %c0_3] : memref<8x128xf32, #tpu.memory_space<vmem>>, vector<8x128xf32>
    %c0_4 = arith.constant 0 : index
    %c0_5 = arith.constant 0 : index
    %7 = vector.load %arg9[%c0_4, %c0_5] : memref<8x128xf32, #tpu.memory_space<vmem>>, vector<8x128xf32>
    %c0_6 = arith.constant 0 : index
    %c0_7 = arith.constant 0 : index
    %8 = vector.load %arg10[%c0_6, %c0_7] : memref<8x128xf32, #tpu.memory_space<vmem>>, vector<8x128xf32>
    %c0_8 = arith.constant 0 : index
    %c0_9 = arith.constant 0 : index
    %9 = vector.load %arg11[%c0_8, %c0_9] : memref<8x128xf32, #tpu.memory_space<vmem>>, vector<8x128xf32>
    %c0_i32_10 = arith.constant 0 : i32
    %c8_i32 = arith.constant 8 : i32
    %10 = arith.addi %c0_i32_10, %c8_i32 : i32
    %c1_i32 = arith.constant 1 : i32
    %11:4 = scf.for %arg12 = %c0_i32_10 to %10 step %c1_i32 iter_args(%arg13 = %6, %arg14 = %7, %arg15 = %8, %arg16 = %9) -> (vector<8x128xf32>, vector<8x128xf32>, vector<8x128xf32>, vector<8x128xf32>)  : i32 {
      %19 = arith.index_cast %arg12 : i32 to index
      %c0_22 = arith.constant 0 : index
      %c0_23 = arith.constant 0 : index
      %20 = vector.load %arg1[%19, %c0_22, %c0_23] : memref<8x8x512xf32, #tpu.memory_space<vmem>>, vector<1x8x512xf32>
      %21 = vector.shape_cast %20 : vector<1x8x512xf32> to vector<8x512xf32>
      %c0_24 = arith.constant 0 : index
      %c0_25 = arith.constant 0 : index
      %22 = vector.load %arg2[%c0_24, %c0_25] : memref<128x512xf32, #tpu.memory_space<vmem>>, vector<128x512xf32>
      %cst = arith.constant dense<0.000000e+00> : vector<8x512xf32>
      %23 = tpu.matmul %arg13, %22, %cst {dimension_numbers = #tpu.dot_dimension_numbers<[1], [0], [0], [1], [0, 0, 1, 1], [], []>} : vector<8x128xf32>, vector<128x512xf32>, vector<8x512xf32> -> vector<8x512xf32>
      %24 = arith.addf %21, %23 : vector<8x512xf32>
      %25 = vector.extract_strided_slice %24 {offsets = [0, 0], sizes = [8, 128], strides = [1, 1]} : vector<8x512xf32> to vector<8x128xf32>
      %26 = arith.negf %25 : vector<8x128xf32>
      %27 = math.exp %26 : vector<8x128xf32>
      %cst_26 = arith.constant 1.000000e+00 : f32
      %28 = vector.broadcast %cst_26 : f32 to vector<8x128xf32>
      %29 = arith.addf %28, %27 : vector<8x128xf32>
      %30 = arith.divf %28, %29 : vector<8x128xf32>
      %31 = vector.extract_strided_slice %24 {offsets = [0, 128], sizes = [8, 128], strides = [1, 1]} : vector<8x512xf32> to vector<8x128xf32>
      %32 = arith.negf %31 : vector<8x128xf32>
      %33 = math.exp %32 : vector<8x128xf32>
      %cst_27 = arith.constant 1.000000e+00 : f32
      %34 = vector.broadcast %cst_27 : f32 to vector<8x128xf32>
      %35 = arith.addf %34, %33 : vector<8x128xf32>
      %36 = arith.divf %34, %35 : vector<8x128xf32>
      %37 = vector.extract_strided_slice %24 {offsets = [0, 256], sizes = [8, 128], strides = [1, 1]} : vector<8x512xf32> to vector<8x128xf32>
      %38 = math.tanh %37 : vector<8x128xf32>
      %39 = vector.extract_strided_slice %24 {offsets = [0, 384], sizes = [8, 128], strides = [1, 1]} : vector<8x512xf32> to vector<8x128xf32>
      %40 = arith.negf %39 : vector<8x128xf32>
      %41 = math.exp %40 : vector<8x128xf32>
      %cst_28 = arith.constant 1.000000e+00 : f32
      %42 = vector.broadcast %cst_28 : f32 to vector<8x128xf32>
      %43 = arith.addf %42, %41 : vector<8x128xf32>
      %44 = arith.divf %42, %43 : vector<8x128xf32>
      %45 = arith.mulf %36, %arg14 : vector<8x128xf32>
      %46 = arith.mulf %30, %38 : vector<8x128xf32>
      %47 = arith.addf %45, %46 : vector<8x128xf32>
      %48 = math.tanh %47 : vector<8x128xf32>
      %49 = arith.mulf %44, %48 : vector<8x128xf32>
      %50 = tpu.concatenate %49, %arg15 in 1 : vector<8x128xf32>, vector<8x128xf32> -> vector<8x256xf32>
      %c0_29 = arith.constant 0 : index
      %c0_30 = arith.constant 0 : index
      %51 = vector.load %arg3[%c0_29, %c0_30] : memref<256x512xf32, #tpu.memory_space<vmem>>, vector<256x512xf32>
      %cst_31 = arith.constant dense<0.000000e+00> : vector<8x512xf32>
      %52 = tpu.matmul %50, %51, %cst_31 {dimension_numbers = #tpu.dot_dimension_numbers<[1], [0], [0], [1], [0, 0, 1, 1], [], []>} : vector<8x256xf32>, vector<256x512xf32>, vector<8x512xf32> -> vector<8x512xf32>
      %53 = arith.addf %52, %5 : vector<8x512xf32>
      %54 = vector.extract_strided_slice %53 {offsets = [0, 0], sizes = [8, 128], strides = [1, 1]} : vector<8x512xf32> to vector<8x128xf32>
      %55 = arith.negf %54 : vector<8x128xf32>
      %56 = math.exp %55 : vector<8x128xf32>
      %cst_32 = arith.constant 1.000000e+00 : f32
      %57 = vector.broadcast %cst_32 : f32 to vector<8x128xf32>
      %58 = arith.addf %57, %56 : vector<8x128xf32>
      %59 = arith.divf %57, %58 : vector<8x128xf32>
      %60 = vector.extract_strided_slice %53 {offsets = [0, 128], sizes = [8, 128], strides = [1, 1]} : vector<8x512xf32> to vector<8x128xf32>
      %61 = arith.negf %60 : vector<8x128xf32>
      %62 = math.exp %61 : vector<8x128xf32>
      %cst_33 = arith.constant 1.000000e+00 : f32
      %63 = vector.broadcast %cst_33 : f32 to vector<8x128xf32>
      %64 = arith.addf %63, %62 : vector<8x128xf32>
      %65 = arith.divf %63, %64 : vector<8x128xf32>
      %66 = vector.extract_strided_slice %53 {offsets = [0, 256], sizes = [8, 128], strides = [1, 1]} : vector<8x512xf32> to vector<8x128xf32>
      %67 = math.tanh %66 : vector<8x128xf32>
      %68 = vector.extract_strided_slice %53 {offsets = [0, 384], sizes = [8, 128], strides = [1, 1]} : vector<8x512xf32> to vector<8x128xf32>
      %69 = arith.negf %68 : vector<8x128xf32>
      %70 = math.exp %69 : vector<8x128xf32>
      %cst_34 = arith.constant 1.000000e+00 : f32
      %71 = vector.broadcast %cst_34 : f32 to vector<8x128xf32>
      %72 = arith.addf %71, %70 : vector<8x128xf32>
      %73 = arith.divf %71, %72 : vector<8x128xf32>
      %74 = arith.mulf %65, %arg16 : vector<8x128xf32>
      %75 = arith.mulf %59, %67 : vector<8x128xf32>
      %76 = arith.addf %74, %75 : vector<8x128xf32>
      %77 = math.tanh %76 : vector<8x128xf32>
      %78 = arith.mulf %73, %77 : vector<8x128xf32>
      scf.yield %49, %47, %78, %76 : vector<8x128xf32>, vector<8x128xf32>, vector<8x128xf32>, vector<8x128xf32>
    }
    %c8_i32_11 = arith.constant 8 : i32
    %c0_12 = arith.constant 0 : index
    %c0_13 = arith.constant 0 : index
    %12 = vector.load %arg8[%c0_12, %c0_13] : memref<8x128xf32, #tpu.memory_space<vmem>>, vector<8x128xf32>
    tpu.vector_store %arg8[%c0_12, %c0_13], %11#0 {strides = array<i32>} : memref<8x128xf32, #tpu.memory_space<vmem>>, vector<8x128xf32>,
    %c0_14 = arith.constant 0 : index
    %c0_15 = arith.constant 0 : index
    %13 = vector.load %arg9[%c0_14, %c0_15] : memref<8x128xf32, #tpu.memory_space<vmem>>, vector<8x128xf32>
    tpu.vector_store %arg9[%c0_14, %c0_15], %11#1 {strides = array<i32>} : memref<8x128xf32, #tpu.memory_space<vmem>>, vector<8x128xf32>,
    %c0_16 = arith.constant 0 : index
    %c0_17 = arith.constant 0 : index
    %14 = vector.load %arg10[%c0_16, %c0_17] : memref<8x128xf32, #tpu.memory_space<vmem>>, vector<8x128xf32>
    tpu.vector_store %arg10[%c0_16, %c0_17], %11#2 {strides = array<i32>} : memref<8x128xf32, #tpu.memory_space<vmem>>, vector<8x128xf32>,
    %c0_18 = arith.constant 0 : index
    %c0_19 = arith.constant 0 : index
    %15 = vector.load %arg11[%c0_18, %c0_19] : memref<8x128xf32, #tpu.memory_space<vmem>>, vector<8x128xf32>
    tpu.vector_store %arg11[%c0_18, %c0_19], %11#3 {strides = array<i32>} : memref<8x128xf32, #tpu.memory_space<vmem>>, vector<8x128xf32>,
    %c0_i32_20 = arith.constant 0 : i32
    %16 = arith.cmpi eq, %arg0, %c0_i32_20 : i32
    %17 = arith.extui %16 : i1 to i32
    %c0_i32_21 = arith.constant 0 : i32
    %18 = arith.cmpi ne, %17, %c0_i32_21 : i32
    scf.if %18 {
      %c0_22 = arith.constant 0 : index
      %c0_23 = arith.constant 0 : index
      %19 = vector.load %arg5[%c0_22, %c0_23] : memref<128x128xf32, #tpu.memory_space<vmem>>, vector<128x128xf32>
      %cst = arith.constant dense<0.000000e+00> : vector<8x128xf32>
      %20 = tpu.matmul %11#2, %19, %cst {dimension_numbers = #tpu.dot_dimension_numbers<[1], [0], [0], [1], [0, 0, 1, 1], [], []>} : vector<8x128xf32>, vector<128x128xf32>, vector<8x128xf32> -> vector<8x128xf32>
      %c0_24 = arith.constant 0 : index
      %c0_25 = arith.constant 0 : index
      %21 = vector.load %arg6[%c0_24, %c0_25] : memref<1x128xf32, #tpu.memory_space<vmem>>, vector<1x128xf32>
      %22 = vector.broadcast %21 : vector<1x128xf32> to vector<8x128xf32>
      %23 = arith.addf %20, %22 : vector<8x128xf32>
      %c0_26 = arith.constant 0 : index
      %c0_27 = arith.constant 0 : index
      %24 = vector.load %arg7[%c0_26, %c0_27] : memref<8x128xf32, #tpu.memory_space<vmem>>, vector<8x128xf32>
      tpu.vector_store %arg7[%c0_26, %c0_27], %23 {strides = array<i32>} : memref<8x128xf32, #tpu.memory_space<vmem>>, vector<8x128xf32>,
    } else {
    }
    return
  }
  func.func @transform_0(%arg0: i32) -> (i32, i32, i32) {
    %c0_i32 = arith.constant 0 : i32
    %c0_i32_0 = arith.constant 0 : i32
    %c0_i32_1 = arith.constant 0 : i32
    return %arg0, %c0_i32, %c0_i32_0 : i32, i32, i32
  }
  func.func @transform_1(%arg0: i32) -> (i32, i32) {
    %c0_i32 = arith.constant 0 : i32
    %c0_i32_0 = arith.constant 0 : i32
    %c0_i32_1 = arith.constant 0 : i32
    return %c0_i32, %c0_i32_0 : i32, i32
  }
  func.func @transform_2(%arg0: i32) -> (i32, i32) {
    %c0_i32 = arith.constant 0 : i32
    %c0_i32_0 = arith.constant 0 : i32
    %c0_i32_1 = arith.constant 0 : i32
    return %c0_i32, %c0_i32_0 : i32, i32
  }
  func.func @transform_3(%arg0: i32) -> (i32, i32) {
    %c0_i32 = arith.constant 0 : i32
    %c0_i32_0 = arith.constant 0 : i32
    %c0_i32_1 = arith.constant 0 : i32
    return %c0_i32, %c0_i32_0 : i32, i32
  }
  func.func @transform_4(%arg0: i32) -> (i32, i32) {
    %c0_i32 = arith.constant 0 : i32
    %c0_i32_0 = arith.constant 0 : i32
    %c0_i32_1 = arith.constant 0 : i32
    return %c0_i32, %c0_i32_0 : i32, i32
  }
  func.func @transform_5(%arg0: i32) -> (i32, i32) {
    %c0_i32 = arith.constant 0 : i32
    %c0_i32_0 = arith.constant 0 : i32
    %c0_i32_1 = arith.constant 0 : i32
    return %c0_i32, %c0_i32_0 : i32, i32
  }
  func.func @transform_6(%arg0: i32) -> (i32, i32) {
    %c0_i32 = arith.constant 0 : i32
    %c0_i32_0 = arith.constant 0 : i32
    %c0_i32_1 = arith.constant 0 : i32
    return %c0_i32, %c0_i32_0 : i32, i32
  }
}

</mosaic_0001>

<bundles_post_ra>
// kernel: tpu_custom_call.1
= control target key start
LH: loop header
LB: loop body
LE: loop exit
PB: predicated region body
PF: predicated region fallthrough
CT: control target
= control target key end

     0   :  { %11 = vsyncpa [#allocation7], 0  ;;  %s1508_s0 = inlined_call_operand.hbm [shape: f32[8,8,512], index: 0, kind: input, shape index: {}]   ;;  %s1509_s1 = inlined_call_operand.hbm [shape: f32[128,512], index: 1, kind: input, shape index: {}]   ;;  %s1510_s2 = inlined_call_operand.hbm [shape: f32[256,512], index: 2, kind: input, shape index: {}]   ;;  %s1511_s3 = inlined_call_operand.vmem [shape: f32[1,512], index: 3, kind: input, shape index: {}]   ;;  %s1512_s4 = inlined_call_operand.hbm [shape: f32[128,128], index: 4, kind: input, shape index: {}]   ;;  %s1513_s5 = inlined_call_operand.vmem [shape: f32[1,128], index: 5, kind: input, shape index: {}]   ;;  %s1514_s6 = inlined_call_operand.hbm [shape: f32[8,128], index: 6, kind: output, shape index: {}]  }
   0x1   :  { %12 = vsyncpa [#allocation10], 0 }
   0x2   :  { %13 = vsyncpa [#allocation13], 0 }
   0x3   :  { %14 = vsyncpa [#allocation8], 0  ;;  %s1316_s21 = smov [#allocation9]   ;;  %s1317_s23 = smov [#allocation6]  }
   0x4   :  { %s32_s22 = sshll.u32 %s1316_s21, 4  ;;  %s20_s24 = sshll.u32 %s1317_s23, 4  ;;  %s33_s22 = int_to_ptr.vmem [resolvable:$true] %s32_s22  ;;  %s1364_s24 = int_to_ptr.vmem [resolvable:$true] %s20_s24 }
   0x5   :  { %s1158_s27 = scalar_lea.hbm %s1509_s1, 8192 }
   0x6   :  { %p1159_p0 = scmp.ne.s32.totalorder %s1509_s1, %s1158_s27  ;;  %p1162_p1 = scmp.lt.u32.totalorder %s1158_s27, %s1509_s1 }
   0x8   :  { %p1164_p2 = pnand %p1162_p1, %p1159_p0 }
   0xa   :  { %1167 = shalt.err (!%p1164_p2)
}
   0xb   :  { %s1168_s8 = scalar_lea.vmem %s33_s22, 8192  ;;  %p1173_p4 = scmp.lt.s32.totalorder %s33_s22, %s33_s22 }
   0xc   :  { %p1169_p3 = scmp.ne.s32.totalorder %s33_s22, %s1168_s8  ;;  %p1174_p5 = scmp.lt.s32.totalorder %s1168_s8, %s1168_s8 }
   0xe   :  { %p1175_p6 = por %p1174_p5, %p1173_p4 }
  0x10   :  { %p1176_p7 = pnand %p1175_p6, %p1169_p3 }
  0x12   :  { %1179 = shalt.err (!%p1176_p7)
}
  0x13   :  { %s1318_s9 = smov 512   ;;  %s1319_s10 = smov 32  }
  0x14   :  { %38 = dma.hbm_to_vmem [thread:$0]  %s1509_s1, 8192, %s33_s22, [#allocation10], %s1318_s9, %s1318_s9, %s1319_s10  }
  0x15   :  { %s1180_s15 = scalar_lea.hbm %s1508_s0, 4096 }
  0x16   :  { %p1181_p8 = scmp.ne.s32.totalorder %s1508_s0, %s1180_s15  ;;  %p1184_p9 = scmp.lt.u32.totalorder %s1180_s15, %s1508_s0 }
  0x18   :  { %p1186_p10 = pnand %p1184_p9, %p1181_p8 }
  0x1a   :  { %1189 = shalt.err (!%p1186_p10)
}
  0x1b   :  { %s1190_s20 = scalar_lea.vmem %s1364_s24, 4096  ;;  %p1195_p12 = scmp.lt.s32.totalorder %s1364_s24, %s1364_s24 }
  0x1c   :  { %p1191_p11 = scmp.ne.s32.totalorder %s1364_s24, %s1190_s20  ;;  %p1196_p13 = scmp.lt.s32.totalorder %s1190_s20, %s1190_s20 }
  0x1e   :  { %p1197_p0 = por %p1196_p13, %p1195_p12 }
  0x20   :  { %p1198_p1 = pnand %p1197_p0, %p1191_p11 }
  0x22   :  { %1201 = shalt.err (!%p1198_p1)
}
  0x23   :  { %26 = dma.hbm_to_vmem [thread:$0]  %s1508_s0, 4096, %s1364_s24, [#allocation7], %s1318_s9, %s1318_s9, %s1319_s10  }
  0x24   :  { %s1320_s22 = smov [#allocation11]   ;;  %s1321_s25 = smov [#allocation12]  }
  0x25   :  { %s44_s23 = sshll.u32 %s1320_s22, 4  ;;  %s58_s26 = sshll.u32 %s1321_s25, 4  ;;  %s45_s23 = int_to_ptr.vmem [resolvable:$true] %s44_s23  ;;  %s1401_s26 = int_to_ptr.vmem [resolvable:$true] %s58_s26 }
  0x26   :  { %s1202_s29 = scalar_lea.hbm %s1510_s2, 16384 }
  0x27   :  { %p1203_p2 = scmp.ne.s32.totalorder %s1510_s2, %s1202_s29  ;;  %p1206_p3 = scmp.lt.u32.totalorder %s1202_s29, %s1510_s2 }
  0x29   :  { %p1208_p4 = pnand %p1206_p3, %p1203_p2 }
  0x2b   :  { %1211 = shalt.err (!%p1208_p4)
}
  0x2c   :  { %s1212_s0 = scalar_lea.vmem %s45_s23, 16384  ;;  %p1217_p6 = scmp.lt.s32.totalorder %s45_s23, %s45_s23 }
  0x2d   :  { %p1213_p5 = scmp.ne.s32.totalorder %s45_s23, %s1212_s0  ;;  %p1218_p7 = scmp.lt.s32.totalorder %s1212_s0, %s1212_s0 }
  0x2f   :  { %p1219_p8 = por %p1218_p7, %p1217_p6 }
  0x31   :  { %p1220_p9 = pnand %p1219_p8, %p1213_p5 }
  0x33   :  { %1223 = shalt.err (!%p1220_p9)
}
  0x34   :  { %50 = dma.hbm_to_vmem [thread:$0]  %s1510_s2, 16384, %s45_s23, [#allocation10], %s1318_s9, %s1318_s9, %s1319_s10  }
  0x35   :  { %s1224_s15 = scalar_lea.hbm %s1512_s4, 2048 }
  0x36   :  { %p1225_p10 = scmp.ne.s32.totalorder %s1512_s4, %s1224_s15  ;;  %p1228_p11 = scmp.lt.u32.totalorder %s1224_s15, %s1512_s4 }
  0x38   :  { %p1230_p12 = pnand %p1228_p11, %p1225_p10 }
  0x3a   :  { %1233 = shalt.err (!%p1230_p12)
}
  0x3b   :  { %s1234_s20 = scalar_lea.vmem %s1401_s26, 2048  ;;  %p1239_p0 = scmp.lt.s32.totalorder %s1401_s26, %s1401_s26 }
  0x3c   :  { %p1235_p13 = scmp.ne.s32.totalorder %s1401_s26, %s1234_s20  ;;  %p1240_p1 = scmp.lt.s32.totalorder %s1234_s20, %s1234_s20 }
  0x3e   :  { %p1241_p2 = por %p1240_p1, %p1239_p0 }
  0x40   :  { %p1242_p3 = pnand %p1241_p2, %p1235_p13 }
  0x42   :  { %1245 = shalt.err (!%p1242_p3)
}
  0x43   :  { %s1322_s2 = smov 128   ;;  %s1323_s9 = smov 8  }
  0x44   :  { %64 = dma.hbm_to_vmem [thread:$0]  %s1512_s4, 2048, %s1401_s26, [#allocation13], %s1322_s2, %s1322_s2, %s1323_s9  }
  0x45   :  { %1288 = dma.done.wait [#allocation7], 4096  }
  0x46   :  { %1289 = vsyncadd [#allocation7], 4294963200 }
  0x47   :  { %1290 = dma.done.wait [#allocation10], 24576  }
  0x48   :  { %1291 = vsyncadd [#allocation10], 4294942720 }
  0x49   :  { %1292 = dma.done.wait [#allocation13], 2048  }
  0x4a   :  { %1293 = vsyncadd [#allocation13], 4294965248  ;;  %v89_v0 = vlaneseq  ;;  %v87_v6 = vld [vmem:[%s1511_s3] sm:$0xf]  ;;  %v1446_v11 = vmov 0.0   ;;  %v1448_v12 = vmov 0.0  }
  0x4b   :  { %v1450_v13 = vmov 0.0   ;;  %v1452_v14 = vmov 0.0   ;;  %s1454_s4 = smov 0  }
  0x4c   :  { %v90_v1 = vshrl.u32 %v89_v0, 7 }
  0x4e   :  { %v91_v2 = vsub.s32 0, %v90_v1  ;;  %v95_v3 = vsub.s32 1, %v90_v1  ;;  %v99_v4 = vsub.s32 2, %v90_v1  ;;  %v103_v5 = vsub.s32 3, %v90_v1 }
  0x50   :  { %v1438_v7 = vrot.slane %v87_v6, %v91_v2  ;;  %v1440_v8 = vrot.slane %v87_v6, %v95_v3  ;;  %v1442_v9 = vrot.slane %v87_v6, %v99_v4  ;;  %v1444_v10 = vrot.slane %v87_v6, %v103_v5 }
  0x51 LB: > { %v131_v15 = vld [vmem:[#allocation9 + $0x8] sm:$0xff]  ;;  %v130_v17 = vld [vmem:[#allocation9] sm:$0xff]  ;;  %v1324_v22 = vmov 0.0   ;;  %v133_v34 = vld [vmem:[#allocation9 + $0x18] sm:$0xff]  ;;  %s804_s3 = sshll.u32 %s1314_s4, 5  ;;  %s118_s4 = sadd.s32 1, %s1314_s4   ;;  %s1314_s4 = sphi %s1454_s4, %s118_s4   ;;  %v1310_v14 = vphi %v1452_v14, %v363_v14   ;;  %v1306_v13 = vphi %v1450_v13, %v361_v13   ;;  %v1302_v12 = vphi %v1448_v12, %v1515_v12   ;;  %v1298_v11 = vphi %v1446_v11, %v655_v11  }
  0x52   : > { %v135_v16 = vld [vmem:[#allocation9 + $0x28] sm:$0xff]  ;;  %v134_v19 = vld [vmem:[#allocation9 + $0x20] sm:$0xff]  ;;  %258 = vmatprep.mubr.f32.mxu0 %v1324_v22  ;;  %329 = vmatprep.mubr.f32.mxu1 %v1324_v22  ;;  %v137_v35 = vld [vmem:[#allocation9 + $0x38] sm:$0xff]  ;;  %s125_s23 = scalar_lea.vmem [#allocation6], %s804_s3  ;;  %p115_p4 = scmp.ge.s32.totalorder %s118_s4, 8  }
  0x53   : > { %v857_v18 = vpack.c.bf16 %v135_v16, %v131_v15  ;;  %v139_v20 = vld [vmem:[#allocation9 + $0x48] sm:$0xff]  ;;  %v859_v23 = vpack.c.bf16 %v134_v19, %v130_v17  ;;  %v138_v25 = vld [vmem:[#allocation9 + $0x40] sm:$0xff]  ;;  %v889_v37 = vpack.c.bf16 %v137_v35, %v133_v34  ;;  %v132_v38 = vld [vmem:[#allocation9 + $0x10] sm:$0xff]  ;;  %vm1326_vm0 = vmmov (%p115_p4), 0   ;;  %s1328_s27 = smov (%p115_p4), [#allocation14]  }
  0x54   : > { %v143_v21 = vld [vmem:[#allocation9 + $0x68] sm:$0xff]  ;;  %v142_v26 = vld [vmem:[#allocation9 + $0x60] sm:$0xff]  ;;  %v136_v39 = vld [vmem:[#allocation9 + $0x30] sm:$0xff]  ;;  %s765_s28 = sshll.u32 (%p115_p4), %s1328_s27, 4  ;;  %s766_s28 = int_to_ptr.vmem [resolvable:$true] %s765_s28 }
  0x55   : > { %v861_v24 = vpack.c.bf16 %v143_v21, %v139_v20  ;;  %v147_v27 = vld [vmem:[#allocation9 + $0x88] sm:$0xff]  ;;  %858 = vmatprep.subr.bf16.mxu0 %v857_v18  ;;  %v863_v29 = vpack.c.bf16 %v142_v26, %v138_v25  ;;  %v146_v30 = vld [vmem:[#allocation9 + $0x80] sm:$0xff]  ;;  %v891_v40 = vpack.c.bf16 %v136_v39, %v132_v38  ;;  %890 = vmatprep.subr.bf16.mxu1 %v889_v37  ;;  %v141_v42 = vld [vmem:[#allocation9 + $0x58] sm:$0xff]  ;;  %s1246_s29 = scalar_lea.vmem (%p115_p4), %s766_s28, 128  ;;  %p1251_p6 = scmp.lt.s32.totalorder (%p115_p4), %s766_s28, %s766_s28 }
  0x56   : > { %v151_v28 = vld [vmem:[#allocation9 + $0xa8] sm:$0xff]  ;;  %860 = vmatpush1.bf16.msra.mxu0 %v859_v23  ;;  %v150_v31 = vld [vmem:[#allocation9 + $0xa0] sm:$0xff]  ;;  %v145_v43 = vld [vmem:[#allocation9 + $0x78] sm:$0xff]  ;;  %p1247_p5 = scmp.ne.s32.totalorder (%p115_p4), %s766_s28, %s1246_s29  ;;  %p1252_p7 = scmp.lt.s32.totalorder (%p115_p4), %s1246_s29, %s1246_s29 }
  0x57   : > { %862 = vmatprep.subr.bf16.mxu0 %v861_v24  ;;  %v865_v32 = vpack.c.bf16 %v151_v28, %v147_v27  ;;  %v155_v33 = vld [vmem:[#allocation9 + $0xc8] sm:$0xff]  ;;  %v867_v41 = vpack.c.bf16 %v150_v31, %v146_v30  ;;  %v140_v44 = vld [vmem:[#allocation9 + $0x50] sm:$0xff]  ;;  %v154_v46 = vld [vmem:[#allocation9 + $0xc0] sm:$0xff]  ;;  %892 = vmatpush1.bf16.msra.mxu1 %v891_v40  ;;  %v893_v48 = vpack.c.bf16 %v145_v43, %v141_v42 }
  0x58   : > { %v159_v36 = vld [vmem:[#allocation9 + $0xe8] sm:$0xff]  ;;  %v158_v47 = vld [vmem:[#allocation9 + $0xe0] sm:$0xff]  ;;  %v144_v49 = vld [vmem:[#allocation9 + $0x70] sm:$0xff]  ;;  %p1253_p8 = por (%p115_p4), %p1252_p7, %p1251_p6 }
  0x59   : > { %v869_v45 = vpack.c.bf16 %v159_v36, %v155_v33  ;;  %v163_v50 = vld [vmem:[#allocation9 + $0x108] sm:$0xff]  ;;  %v895_v52 = vpack.c.bf16 %v144_v49, %v140_v44  ;;  %v149_v53 = vld [vmem:[#allocation9 + $0x98] sm:$0xff]  ;;  %894 = vmatprep.subr.bf16.mxu1 %v893_v48  ;;  %v148_v55 = vld [vmem:[#allocation9 + $0x90] sm:$0xff]  ;;  %v871_v57 = vpack.c.bf16 %v158_v47, %v154_v46 }
  0x5a   : > { %864 = vmatpush1.bf16.msra.mxu0 %v863_v29  ;;  %v167_v51 = vld [vmem:[#allocation9 + $0x128] sm:$0xff]  ;;  %v153_v54 = vld [vmem:[#allocation9 + $0xb8] sm:$0xff]  ;;  %v152_v56 = vld [vmem:[#allocation9 + $0xb0] sm:$0xff]  ;;  %p1254_p9 = pnand (%p115_p4), %p1253_p8, %p1247_p5 }
  0x5b   : > { %866 = vmatprep.subr.bf16.mxu0 %v865_v32  ;;  %v162_v58 = vld [vmem:[#allocation9 + $0x100] sm:$0xff]  ;;  %v897_v60 = vpack.c.bf16 %v153_v54, %v149_v53  ;;  %v873_v61 = vpack.c.bf16 %v167_v51, %v163_v50  ;;  %896 = vmatpush1.bf16.msra.mxu1 %v895_v52  ;;  %v171_v62 = vld [vmem:[#allocation9 + $0x148] sm:$0xff]  ;;  %v899_v63 = vpack.c.bf16 %v152_v56, %v148_v55  ;;  %v157_v0 = vld [vmem:[#allocation9 + $0xd8] sm:$0xff] }
  0x5c   : > { %v166_v59 = vld [vmem:[#allocation9 + $0x120] sm:$0xff]  ;;  %v161_v1 = vld [vmem:[#allocation9 + $0xf8] sm:$0xff]  ;;  %v175_v2 = vld [vmem:[#allocation9 + $0x168] sm:$0xff] }
  0x5d   : > { %898 = vmatprep.subr.bf16.mxu1 %v897_v60  ;;  %v901_v3 = vpack.c.bf16 %v161_v1, %v157_v0  ;;  %v156_v4 = vld [vmem:[#allocation9 + $0xd0] sm:$0xff]  ;;  %v875_v6 = vpack.c.bf16 %v166_v59, %v162_v58  ;;  %v165_v15 = vld [vmem:[#allocation9 + $0x118] sm:$0xff]  ;;  %v877_v17 = vpack.c.bf16 %v175_v2, %v171_v62  ;;  %v170_v18 = vld [vmem:[#allocation9 + $0x140] sm:$0xff] }
  0x5e   : > { %868 = vmatpush1.bf16.msra.mxu0 %v867_v41  ;;  %v160_v5 = vld [vmem:[#allocation9 + $0xf0] sm:$0xff]  ;;  %v169_v16 = vld [vmem:[#allocation9 + $0x138] sm:$0xff]  ;;  %v174_v19 = vld [vmem:[#allocation9 + $0x160] sm:$0xff] }
  0x5f   : > { %870 = vmatprep.subr.bf16.mxu0 %v869_v45  ;;  %900 = vmatpush1.bf16.msra.mxu1 %v899_v63  ;;  %v179_v20 = vld [vmem:[#allocation9 + $0x188] sm:$0xff]  ;;  %v903_v21 = vpack.c.bf16 %v160_v5, %v156_v4  ;;  %v905_v23 = vpack.c.bf16 %v169_v16, %v165_v15  ;;  %v164_v24 = vld [vmem:[#allocation9 + $0x110] sm:$0xff]  ;;  %v173_v26 = vld [vmem:[#allocation9 + $0x158] sm:$0xff]  ;;  %v879_v28 = vpack.c.bf16 %v174_v19, %v170_v18 }
  0x60   : > { %v183_v22 = vld [vmem:[#allocation9 + $0x1a8] sm:$0xff]  ;;  %902 = vmatprep.subr.bf16.mxu1 %v901_v3  ;;  %v168_v25 = vld [vmem:[#allocation9 + $0x130] sm:$0xff]  ;;  %v177_v27 = vld [vmem:[#allocation9 + $0x178] sm:$0xff] }
  0x61   : > { %v881_v29 = vpack.c.bf16 %v183_v22, %v179_v20  ;;  %v178_v30 = vld [vmem:[#allocation9 + $0x180] sm:$0xff]  ;;  %v187_v32 = vld [vmem:[#allocation9 + $0x1c8] sm:$0xff]  ;;  %v907_v33 = vpack.c.bf16 %v168_v25, %v164_v24  ;;  %v909_v35 = vpack.c.bf16 %v177_v27, %v173_v26  ;;  %v172_v36 = vld [vmem:[#allocation9 + $0x150] sm:$0xff] }
  0x62   : > { %872 = vmatpush1.bf16.msra.mxu0 %v871_v57  ;;  %v182_v31 = vld [vmem:[#allocation9 + $0x1a0] sm:$0xff]  ;;  %v191_v34 = vld [vmem:[#allocation9 + $0x1e8] sm:$0xff]  ;;  %v176_v37 = vld [vmem:[#allocation9 + $0x170] sm:$0xff] }
  0x63   : > { %874 = vmatprep.subr.bf16.mxu0 %v873_v61  ;;  %904 = vmatpush1.bf16.msra.mxu1 %v903_v21  ;;  %v181_v38 = vld [vmem:[#allocation9 + $0x198] sm:$0xff]  ;;  %v883_v40 = vpack.c.bf16 %v182_v31, %v178_v30  ;;  %v885_v41 = vpack.c.bf16 %v191_v34, %v187_v32  ;;  %v186_v42 = vld [vmem:[#allocation9 + $0x1c0] sm:$0xff]  ;;  %v911_v44 = vpack.c.bf16 %v176_v37, %v172_v36  ;;  %v180_v45 = vld [vmem:[#allocation9 + $0x190] sm:$0xff] }
  0x64   : > { %906 = vmatprep.subr.bf16.mxu1 %v905_v23  ;;  %v185_v39 = vld [vmem:[#allocation9 + $0x1b8] sm:$0xff]  ;;  %v190_v43 = vld [vmem:[#allocation9 + $0x1e0] sm:$0xff]  ;;  %v184_v47 = vld [vmem:[#allocation9 + $0x1b0] sm:$0xff] }
  0x65   : > { %v913_v46 = vpack.c.bf16 %v185_v39, %v181_v38  ;;  %v365_v48 = vld [vmem:[#allocation11 + $0x8] sm:$0xff]  ;;  %v189_v50 = vld [vmem:[#allocation9 + $0x1d8] sm:$0xff]  ;;  %v887_v52 = vpack.c.bf16 %v190_v43, %v186_v42  ;;  %v915_v53 = vpack.c.bf16 %v184_v47, %v180_v45  ;;  %v188_v54 = vld [vmem:[#allocation9 + $0x1d0] sm:$0xff] }
  0x66   : > { %876 = vmatpush1.bf16.msra.mxu0 %v875_v6  ;;  %v369_v49 = vld [vmem:[#allocation11 + $0x28] sm:$0xff]  ;;  %v193_v51 = vld [vmem:[#allocation9 + $0x1f8] sm:$0xff]  ;;  %v364_v56 = vld [vmem:[#allocation11] sm:$0xff] }
  0x67   : > { %878 = vmatprep.subr.bf16.mxu0 %v877_v17  ;;  %908 = vmatpush1.bf16.msra.mxu1 %v907_v33  ;;  %v921_v55 = vpack.c.bf16 %v369_v49, %v365_v48  ;;  %v368_v57 = vld [vmem:[#allocation11 + $0x20] sm:$0xff]  ;;  %v917_v58 = vpack.c.bf16 %v193_v51, %v189_v50  ;;  %v192_v59 = vld [vmem:[#allocation9 + $0x1f0] sm:$0xff]  ;;  %v373_v60 = vld [vmem:[#allocation11 + $0x48] sm:$0xff] }
  0x68   : > { %910 = vmatprep.subr.bf16.mxu1 %v909_v35  ;;  %v377_v61 = vld [vmem:[#allocation11 + $0x68] sm:$0xff]  ;;  %v367_v62 = vld [vmem:[#allocation11 + $0x18] sm:$0xff]  ;;  %v923_v0 = vpack.c.bf16 %v368_v57, %v364_v56  ;;  %v919_v1 = vpack.c.bf16 %v192_v59, %v188_v54  ;;  %v366_v2 = vld [vmem:[#allocation11 + $0x10] sm:$0xff] }
  0x69   : > { %v371_v63 = vld [vmem:[#allocation11 + $0x38] sm:$0xff]  ;;  %v925_v3 = vpack.c.bf16 %v377_v61, %v373_v60  ;;  %v372_v4 = vld [vmem:[#allocation11 + $0x40] sm:$0xff]  ;;  %v370_v15 = vld [vmem:[#allocation11 + $0x30] sm:$0xff] }
  0x6a   : > { %880 = vmatpush1.bf16.msra.mxu0 %v879_v28  ;;  %v376_v5 = vld [vmem:[#allocation11 + $0x60] sm:$0xff]  ;;  %v985_v6 = vpack.c.bf16 %v371_v63, %v367_v62  ;;  %v381_v16 = vld [vmem:[#allocation11 + $0x88] sm:$0xff]  ;;  %v375_v18 = vld [vmem:[#allocation11 + $0x58] sm:$0xff]  ;;  %v987_v21 = vpack.c.bf16 %v370_v15, %v366_v2 }
  0x6b   : > { %882 = vmatprep.subr.bf16.mxu0 %v881_v29  ;;  %912 = vmatpush1.bf16.msra.mxu1 %v911_v44  ;;  %v385_v17 = vld [vmem:[#allocation11 + $0xa8] sm:$0xff]  ;;  %v379_v19 = vld [vmem:[#allocation11 + $0x78] sm:$0xff]  ;;  %v927_v20 = vpack.c.bf16 %v376_v5, %v372_v4  ;;  %v374_v22 = vld [vmem:[#allocation11 + $0x50] sm:$0xff] }
  0x6c   : > { %914 = vmatprep.subr.bf16.mxu1 %v913_v46  ;;  %v929_v23 = vpack.c.bf16 %v385_v17, %v381_v16  ;;  %v380_v24 = vld [vmem:[#allocation11 + $0x80] sm:$0xff]  ;;  %v989_v26 = vpack.c.bf16 %v379_v19, %v375_v18  ;;  %v378_v27 = vld [vmem:[#allocation11 + $0x70] sm:$0xff]  ;;  %v389_v28 = vld [vmem:[#allocation11 + $0xc8] sm:$0xff] }
  0x6d   : > { %v384_v25 = vld [vmem:[#allocation11 + $0xa0] sm:$0xff]  ;;  %v393_v29 = vld [vmem:[#allocation11 + $0xe8] sm:$0xff]  ;;  %v383_v30 = vld [vmem:[#allocation11 + $0x98] sm:$0xff]  ;;  %v991_v33 = vpack.c.bf16 %v378_v27, %v374_v22 }
  0x6e   : > { %884 = vmatpush1.bf16.msra.mxu0 %v883_v40  ;;  %v387_v31 = vld [vmem:[#allocation11 + $0xb8] sm:$0xff]  ;;  %v931_v32 = vpack.c.bf16 %v384_v25, %v380_v24  ;;  %v382_v34 = vld [vmem:[#allocation11 + $0x90] sm:$0xff]  ;;  %v933_v35 = vpack.c.bf16 %v393_v29, %v389_v28  ;;  %v388_v36 = vld [vmem:[#allocation11 + $0xc0] sm:$0xff] }
  0x6f   : > { %886 = vmatprep.subr.bf16.mxu0 %v885_v41  ;;  %916 = vmatpush1.bf16.msra.mxu1 %v915_v53  ;;  %v392_v37 = vld [vmem:[#allocation11 + $0xe0] sm:$0xff]  ;;  %v993_v38 = vpack.c.bf16 %v387_v31, %v383_v30  ;;  %v386_v39 = vld [vmem:[#allocation11 + $0xb0] sm:$0xff]  ;;  %v397_v40 = vld [vmem:[#allocation11 + $0x108] sm:$0xff] }
  0x70   : > { %918 = vmatprep.subr.bf16.mxu1 %v917_v58  ;;  %v401_v41 = vld [vmem:[#allocation11 + $0x128] sm:$0xff]  ;;  %v391_v42 = vld [vmem:[#allocation11 + $0xd8] sm:$0xff]  ;;  %v935_v44 = vpack.c.bf16 %v392_v37, %v388_v36  ;;  %v390_v47 = vld [vmem:[#allocation11 + $0xd0] sm:$0xff] }
  0x71   : > { %v395_v43 = vld [vmem:[#allocation11 + $0xf8] sm:$0xff]  ;;  %v937_v45 = vpack.c.bf16 %v401_v41, %v397_v40  ;;  %v394_v48 = vld [vmem:[#allocation11 + $0xf0] sm:$0xff]  ;;  %v396_v53 = vld [vmem:[#allocation11 + $0x100] sm:$0xff] }
  0x72   : > { %888 = vmatpush1.bf16.msra.mxu0 %v887_v52  ;;  %v997_v46 = vpack.c.bf16 %v395_v43, %v391_v42  ;;  %v399_v49 = vld [vmem:[#allocation11 + $0x118] sm:$0xff]  ;;  %v999_v51 = vpack.c.bf16 %v394_v48, %v390_v47  ;;  %v400_v54 = vld [vmem:[#allocation11 + $0x120] sm:$0xff]  ;;  %v402_v57 = vld [vmem:[#allocation11 + $0x130] sm:$0xff] }
  0x73   : > { %922 = vmatprep.subr.bf16.mxu0 %v921_v55  ;;  %920 = vmatpush1.bf16.msra.mxu1 %v919_v1  ;;  %v403_v50 = vld [vmem:[#allocation11 + $0x138] sm:$0xff]  ;;  %v398_v55 = vld [vmem:[#allocation11 + $0x110] sm:$0xff]  ;;  %v939_v56 = vpack.c.bf16 %v400_v54, %v396_v53  ;;  %v405_v59 = vld [vmem:[#allocation11 + $0x148] sm:$0xff] }
  0x74   : > { %986 = vmatprep.subr.bf16.mxu1 %v985_v6  ;;  %v1001_v52 = vpack.c.bf16 %v403_v50, %v399_v49  ;;  %v1003_v58 = vpack.c.bf16 %v402_v57, %v398_v55  ;;  %v409_v60 = vld [vmem:[#allocation11 + $0x168] sm:$0xff]  ;;  %v407_v61 = vld [vmem:[#allocation11 + $0x158] sm:$0xff]  ;;  %v408_v2 = vld [vmem:[#allocation11 + $0x160] sm:$0xff] }
  0x75   : > { %259 = vmatmul.mubr.f32.vlgmr.msra.gmra.mrb[0].mxu0 %v1310_v14  ;;  %v941_v62 = vpack.c.bf16 %v409_v60, %v405_v59  ;;  %v411_v63 = vld [vmem:[#allocation11 + $0x178] sm:$0xff]  ;;  %v410_v4 = vld [vmem:[#allocation11 + $0x170] sm:$0xff]  ;;  %v413_v15 = vld [vmem:[#allocation11 + $0x188] sm:$0xff] }
  0x76   : > { %924 = vmatpush1.bf16.msra.mxu0 %v923_v0  ;;  %330 = vmatmul.mubr.f32.vlgmr.msra.gmra.mrb[0].mxu1 %v1310_v14  ;;  %v995_v14 = vpack.c.bf16 %v386_v39, %v382_v34  ;;  %v404_v0 = vld [vmem:[#allocation11 + $0x140] sm:$0xff]  ;;  %v1005_v1 = vpack.c.bf16 %v411_v63, %v407_v61  ;;  %v417_v16 = vld [vmem:[#allocation11 + $0x1a8] sm:$0xff]  ;;  %v415_v17 = vld [vmem:[#allocation11 + $0x198] sm:$0xff] }
  0x77   : > { %926 = vmatprep.subr.bf16.mxu0 %v925_v3  ;;  %988 = vmatpush1.bf16.msra.mxu1 %v987_v21  ;;  %v406_v3 = vld [vmem:[#allocation11 + $0x150] sm:$0xff]  ;;  %v943_v5 = vpack.c.bf16 %v408_v2, %v404_v0  ;;  %v945_v18 = vpack.c.bf16 %v417_v16, %v413_v15  ;;  %v419_v19 = vld [vmem:[#allocation11 + $0x1b8] sm:$0xff]  ;;  %v416_v21 = vld [vmem:[#allocation11 + $0x1a0] sm:$0xff] }
  0x78   : > { %990 = vmatprep.subr.bf16.mxu1 %v989_v26  ;;  %v1007_v6 = vpack.c.bf16 %v410_v4, %v406_v3  ;;  %v1009_v22 = vpack.c.bf16 %v419_v19, %v415_v17  ;;  %v414_v24 = vld [vmem:[#allocation11 + $0x190] sm:$0xff]  ;;  %v421_v27 = vld [vmem:[#allocation11 + $0x1c8] sm:$0xff]  ;;  %v423_v29 = vld [vmem:[#allocation11 + $0x1d8] sm:$0xff]  ;;  %556 = vmatprep.mubr.f32.mxu0 %v1302_v12 }
  0x79   : > { %v418_v25 = vld [vmem:[#allocation11 + $0x1b0] sm:$0xff]  ;;  %v425_v28 = vld [vmem:[#allocation11 + $0x1e8] sm:$0xff]  ;;  %v427_v31 = vld [vmem:[#allocation11 + $0x1f8] sm:$0xff]  ;;  %627 = vmatprep.mubr.f32.mxu1 %v1302_v12 }
  0x7a   : > { %928 = vmatpush1.bf16.msra.mxu0 %v927_v20  ;;  %v412_v20 = vld [vmem:[#allocation11 + $0x180] sm:$0xff]  ;;  %v1011_v26 = vpack.c.bf16 %v418_v25, %v414_v24  ;;  %v949_v30 = vpack.c.bf16 %v425_v28, %v421_v27  ;;  %v1013_v34 = vpack.c.bf16 %v427_v31, %v423_v29  ;;  %v422_v36 = vld [vmem:[#allocation11 + $0x1d0] sm:$0xff]  ;;  %v429_v39 = vld [vmem:[#allocation11 + $0x208] sm:$0xff] }
  0x7b   : > { %930 = vmatprep.subr.bf16.mxu0 %v929_v23  ;;  %992 = vmatpush1.bf16.msra.mxu1 %v991_v33  ;;  %v947_v23 = vpack.c.bf16 %v416_v21, %v412_v20  ;;  %v424_v33 = vld [vmem:[#allocation11 + $0x1e0] sm:$0xff]  ;;  %v426_v37 = vld [vmem:[#allocation11 + $0x1f0] sm:$0xff]  ;;  %v433_v40 = vld [vmem:[#allocation11 + $0x228] sm:$0xff] }
  0x7c   : > { %994 = vmatprep.subr.bf16.mxu1 %v993_v38  ;;  %v1015_v38 = vpack.c.bf16 %v426_v37, %v422_v36  ;;  %v431_v41 = vld [vmem:[#allocation11 + $0x218] sm:$0xff]  ;;  %v953_v42 = vpack.c.bf16 %v433_v40, %v429_v39  ;;  %v430_v47 = vld [vmem:[#allocation11 + $0x210] sm:$0xff]  ;;  %v437_v50 = vld [vmem:[#allocation11 + $0x248] sm:$0xff] }
  0x7d   : > { %v435_v43 = vld [vmem:[#allocation11 + $0x238] sm:$0xff]  ;;  %v434_v48 = vld [vmem:[#allocation11 + $0x230] sm:$0xff]  ;;  %v436_v55 = vld [vmem:[#allocation11 + $0x240] sm:$0xff] }
  0x7e   : > { %932 = vmatpush1.bf16.msra.mxu0 %v931_v32  ;;  %v420_v32 = vld [vmem:[#allocation11 + $0x1c0] sm:$0xff]  ;;  %v1019_v49 = vpack.c.bf16 %v434_v48, %v430_v47  ;;  %v443_v54 = vld [vmem:[#allocation11 + $0x278] sm:$0xff]  ;;  %v438_v59 = vld [vmem:[#allocation11 + $0x250] sm:$0xff] }
  0x7f   : > { %934 = vmatprep.subr.bf16.mxu0 %v933_v35  ;;  %996 = vmatpush1.bf16.msra.mxu1 %v995_v14  ;;  %v951_v35 = vpack.c.bf16 %v424_v33, %v420_v32  ;;  %v432_v14 = vld [vmem:[#allocation11 + $0x220] sm:$0xff]  ;;  %v442_v60 = vld [vmem:[#allocation11 + $0x270] sm:$0xff]  ;;  %v449_v63 = vld [vmem:[#allocation11 + $0x2a8] sm:$0xff] }
  0x80   : > { %998 = vmatprep.subr.bf16.mxu1 %v997_v46  ;;  %v1023_v61 = vpack.c.bf16 %v442_v60, %v438_v59  ;;  %v447_v0 = vld [vmem:[#allocation11 + $0x298] sm:$0xff]  ;;  %v444_v3 = vld [vmem:[#allocation11 + $0x280] sm:$0xff]  ;;  %v446_v15 = vld [vmem:[#allocation11 + $0x290] sm:$0xff] }
  0x81   : > { %v451_v2 = vld [vmem:[#allocation11 + $0x2b8] sm:$0xff]  ;;  %v448_v4 = vld [vmem:[#allocation11 + $0x2a0] sm:$0xff]  ;;  %v450_v16 = vld [vmem:[#allocation11 + $0x2b0] sm:$0xff] }
  0x82   : > { %936 = vmatpush1.bf16.msra.mxu0 %v935_v44  ;;  %v428_v44 = vld [vmem:[#allocation11 + $0x200] sm:$0xff]  ;;  %v1027_v17 = vpack.c.bf16 %v450_v16, %v446_v15  ;;  %v457_v19 = vld [vmem:[#allocation11 + $0x2e8] sm:$0xff]  ;;  %v455_v20 = vld [vmem:[#allocation11 + $0x2d8] sm:$0xff] }
  0x83   : > { %938 = vmatprep.subr.bf16.mxu0 %v937_v45  ;;  %1000 = vmatpush1.bf16.msra.mxu1 %v999_v51  ;;  %v1017_v45 = vpack.c.bf16 %v435_v43, %v431_v41  ;;  %v955_v46 = vpack.c.bf16 %v432_v14, %v428_v44  ;;  %v441_v51 = vld [vmem:[#allocation11 + $0x268] sm:$0xff]  ;;  %v456_v24 = vld [vmem:[#allocation11 + $0x2e0] sm:$0xff]  ;;  %v454_v27 = vld [vmem:[#allocation11 + $0x2d0] sm:$0xff] }
  0x84   : > { %1002 = vmatprep.subr.bf16.mxu1 %v1001_v52  ;;  %v439_v52 = vld [vmem:[#allocation11 + $0x258] sm:$0xff]  ;;  %v957_v53 = vpack.c.bf16 %v441_v51, %v437_v50  ;;  %v458_v28 = vld [vmem:[#allocation11 + $0x2f0] sm:$0xff]  ;;  %v465_v31 = vld [vmem:[#allocation11 + $0x328] sm:$0xff] }
  0x85   : > { %v1021_v57 = vpack.c.bf16 %v443_v54, %v439_v52  ;;  %v1031_v29 = vpack.c.bf16 %v458_v28, %v454_v27  ;;  %v463_v32 = vld [vmem:[#allocation11 + $0x318] sm:$0xff]  ;;  %v464_v36 = vld [vmem:[#allocation11 + $0x320] sm:$0xff]  ;;  %v462_v39 = vld [vmem:[#allocation11 + $0x310] sm:$0xff] }
  0x86   : > { %940 = vmatpush1.bf16.msra.mxu0 %v939_v56  ;;  %v440_v56 = vld [vmem:[#allocation11 + $0x260] sm:$0xff]  ;;  %v466_v40 = vld [vmem:[#allocation11 + $0x330] sm:$0xff]  ;;  %v473_v43 = vld [vmem:[#allocation11 + $0x368] sm:$0xff] }
  0x87   : > { %1004 = vmatpush1.bf16.msra.mxu1 %v1003_v58  ;;  %942 = vmatprep.subr.bf16.mxu0 %v941_v62  ;;  %v959_v58 = vpack.c.bf16 %v440_v56, %v436_v55  ;;  %v445_v62 = vld [vmem:[#allocation11 + $0x288] sm:$0xff]  ;;  %v1035_v41 = vpack.c.bf16 %v466_v40, %v462_v39  ;;  %v471_v44 = vld [vmem:[#allocation11 + $0x358] sm:$0xff]  ;;  %v472_v47 = vld [vmem:[#allocation11 + $0x360] sm:$0xff] }
  0x88   : > { %1006 = vmatprep.subr.bf16.mxu1 %v1005_v1  ;;  %v961_v1 = vpack.c.bf16 %v449_v63, %v445_v62  ;;  %v470_v50 = vld [vmem:[#allocation11 + $0x350] sm:$0xff]  ;;  %v477_v52 = vld [vmem:[#allocation11 + $0x388] sm:$0xff]  ;;  %v479_v55 = vld [vmem:[#allocation11 + $0x398] sm:$0xff] }
  0x89   : > { %v474_v51 = vld [vmem:[#allocation11 + $0x370] sm:$0xff]  ;;  %v481_v54 = vld [vmem:[#allocation11 + $0x3a8] sm:$0xff]  ;;  %v483_v56 = vld [vmem:[#allocation11 + $0x3b8] sm:$0xff] }
  0x8a   : > { %944 = vmatpush1.bf16.msra.mxu0 %v943_v5  ;;  %v1025_v5 = vpack.c.bf16 %v451_v2, %v447_v0  ;;  %v476_v59 = vld [vmem:[#allocation11 + $0x380] sm:$0xff]  ;;  %v482_v63 = vld [vmem:[#allocation11 + $0x3b0] sm:$0xff]  ;;  %v485_v0 = vld [vmem:[#allocation11 + $0x3c8] sm:$0xff] }
  0x8b   : > { %1008 = vmatpush1.bf16.msra.mxu1 %v1007_v6  ;;  %946 = vmatprep.subr.bf16.mxu0 %v945_v18  ;;  %v963_v6 = vpack.c.bf16 %v448_v4, %v444_v3  ;;  %v453_v18 = vld [vmem:[#allocation11 + $0x2c8] sm:$0xff]  ;;  %v480_v60 = vld [vmem:[#allocation11 + $0x3a0] sm:$0xff]  ;;  %v487_v4 = vld [vmem:[#allocation11 + $0x3d8] sm:$0xff] }
  0x8c   : > { %1010 = vmatprep.subr.bf16.mxu1 %v1009_v22  ;;  %v965_v21 = vpack.c.bf16 %v457_v19, %v453_v18  ;;  %v459_v22 = vld [vmem:[#allocation11 + $0x2f8] sm:$0xff]  ;;  %v979_v62 = vpack.c.bf16 %v480_v60, %v476_v59  ;;  %v488_v16 = vld [vmem:[#allocation11 + $0x3e0] sm:$0xff]  ;;  %v490_v18 = vld [vmem:[#allocation11 + $0x3f0] sm:$0xff] }
  0x8d   : > { %v1029_v25 = vpack.c.bf16 %v459_v22, %v455_v20  ;;  %v127_v22 = vld [vmem:[%s125_s23 + $0x8] sm:$0xff] }
  0x8e   : > { %948 = vmatpush1.bf16.msra.mxu0 %v947_v23  ;;  %v452_v23 = vld [vmem:[#allocation11 + $0x2c0] sm:$0xff] }
  0x8f   : > { %1012 = vmatpush1.bf16.msra.mxu1 %v1011_v26  ;;  %950 = vmatprep.subr.bf16.mxu0 %v949_v30  ;;  %v967_v26 = vpack.c.bf16 %v456_v24, %v452_v23  ;;  %v461_v30 = vld [vmem:[#allocation11 + $0x308] sm:$0xff] }
  0x90   : > { %1014 = vmatprep.subr.bf16.mxu1 %v1013_v34  ;;  %v969_v33 = vpack.c.bf16 %v465_v31, %v461_v30  ;;  %v467_v34 = vld [vmem:[#allocation11 + $0x338] sm:$0xff] }
  0x91   : > { %v1033_v37 = vpack.c.bf16 %v467_v34, %v463_v32  ;;  %v128_v32 = vld [vmem:[%s125_s23 + $0x10] sm:$0xff] }
  0x92   : > { %952 = vmatpush1.bf16.msra.mxu0 %v951_v35  ;;  %v460_v35 = vld [vmem:[#allocation11 + $0x300] sm:$0xff] }
  0x93   : > { %1016 = vmatpush1.bf16.msra.mxu1 %v1015_v38  ;;  %954 = vmatprep.subr.bf16.mxu0 %v953_v42  ;;  %v971_v38 = vpack.c.bf16 %v464_v36, %v460_v35  ;;  %v469_v42 = vld [vmem:[#allocation11 + $0x348] sm:$0xff] }
  0x94   : > { %1018 = vmatprep.subr.bf16.mxu1 %v1017_v45  ;;  %v973_v14 = vpack.c.bf16 %v473_v43, %v469_v42  ;;  %v475_v45 = vld [vmem:[#allocation11 + $0x378] sm:$0xff] }
  0x95   : > { %v1037_v48 = vpack.c.bf16 %v475_v45, %v471_v44 }
  0x96   : > { %956 = vmatpush1.bf16.msra.mxu0 %v955_v46  ;;  %v468_v46 = vld [vmem:[#allocation11 + $0x340] sm:$0xff] }
  0x97   : > { %1020 = vmatpush1.bf16.msra.mxu1 %v1019_v49  ;;  %958 = vmatprep.subr.bf16.mxu0 %v957_v53  ;;  %v975_v49 = vpack.c.bf16 %v472_v47, %v468_v46  ;;  %v1039_v53 = vpack.c.bf16 %v474_v51, %v470_v50 }
  0x98   : > { %1022 = vmatprep.subr.bf16.mxu1 %v1021_v57  ;;  %v977_v57 = vpack.c.bf16 %v481_v54, %v477_v52 }
  0x9a   : > { %960 = vmatpush1.bf16.msra.mxu0 %v959_v58  ;;  %v1041_v58 = vpack.c.bf16 %v483_v56, %v479_v55 }
  0x9b   : > { %1024 = vmatpush1.bf16.msra.mxu1 %v1023_v61  ;;  %962 = vmatprep.subr.bf16.mxu0 %v961_v1  ;;  %v478_v61 = vld [vmem:[#allocation11 + $0x390] sm:$0xff]  ;;  %v489_v1 = vld [vmem:[#allocation11 + $0x3e8] sm:$0xff] }
  0x9c   : > { %1026 = vmatprep.subr.bf16.mxu1 %v1025_v5  ;;  %v1043_v2 = vpack.c.bf16 %v482_v63, %v478_v61  ;;  %v981_v3 = vpack.c.bf16 %v489_v1, %v485_v0  ;;  %v491_v5 = vld [vmem:[#allocation11 + $0x3f8] sm:$0xff] }
  0x9d   : > { %v1045_v15 = vpack.c.bf16 %v491_v5, %v487_v4 }
  0x9e   : > { %964 = vmatpush1.bf16.msra.mxu0 %v963_v6  ;;  %v484_v6 = vld [vmem:[#allocation11 + $0x3c0] sm:$0xff] }
  0x9f   : > { %1028 = vmatpush1.bf16.msra.mxu1 %v1027_v17  ;;  %966 = vmatprep.subr.bf16.mxu0 %v965_v21  ;;  %v486_v17 = vld [vmem:[#allocation11 + $0x3d0] sm:$0xff]  ;;  %v983_v19 = vpack.c.bf16 %v488_v16, %v484_v6  ;;  %v126_v21 = vld [vmem:[%s125_s23] sm:$0xff] }
  0xa0   : > { %1030 = vmatprep.subr.bf16.mxu1 %v1029_v25  ;;  %v1047_v20 = vpack.c.bf16 %v490_v18, %v486_v17  ;;  %v665_v16 = vld [vmem:[#allocation12] sm:$0xff] (%p115_p4)  ;;  %v666_v17 = vld [vmem:[#allocation12 + $0x8] sm:$0xff] (%p115_p4)  ;;  %v667_v18 = vld [vmem:[#allocation12 + $0x10] sm:$0xff] (%p115_p4) }
  0xa2   : > { %968 = vmatpush1.bf16.msra.mxu0 %v967_v26 }
  0xa3   : > { %1032 = vmatpush1.bf16.msra.mxu1 %v1031_v29  ;;  %970 = vmatprep.subr.bf16.mxu0 %v969_v33  ;;  %v129_v29 = vld [vmem:[%s125_s23 + $0x18] sm:$0xff] }
  0xa4   : > { %1034 = vmatprep.subr.bf16.mxu1 %v1033_v37 }
  0xa6   : > { %972 = vmatpush1.bf16.msra.mxu0 %v971_v38 }
  0xa7   : > { %1036 = vmatpush1.bf16.msra.mxu1 %v1035_v41  ;;  %974 = vmatprep.subr.bf16.mxu0 %v973_v14 }
  0xa8   : > { %1038 = vmatprep.subr.bf16.mxu1 %v1037_v48 }
  0xaa   : > { %976 = vmatpush1.bf16.msra.mxu0 %v975_v49 }
  0xab   : > { %1040 = vmatpush1.bf16.msra.mxu1 %v1039_v53  ;;  %978 = vmatprep.subr.bf16.mxu0 %v977_v57 }
  0xac   : > { %1042 = vmatprep.subr.bf16.mxu1 %v1041_v58 }
  0xae   : > { %980 = vmatpush1.bf16.msra.mxu0 %v979_v62 }
  0xaf   : > { %1044 = vmatpush1.bf16.msra.mxu1 %v1043_v2  ;;  %982 = vmatprep.subr.bf16.mxu0 %v981_v3 }
  0xb0   : > { %1046 = vmatprep.subr.bf16.mxu1 %v1045_v15 }
  0xb2   : > { %984 = vmatpush1.bf16.msra.mxu0 %v983_v19  ;;  %v1325_v19 = vmov (%p115_p4), 0.0|0.0  }
  0xb3   : > { %1048 = vmatpush1.bf16.msra.mxu1 %v1047_v20  ;;  %1049 = vmatprep.subr.bf16.mxu0 (%p115_p4), %v1325_v19  ;;  %v1050_v20 = vpack.c.bf16 (%p115_p4), %v666_v17, %v665_v16 }
 0x148   : > { %v260_v23 = vpop.f32.mrb[0].mxu0 }
 0x149   : > { %v336_v24 = vadd.f32 %v260_v23, %v126_v21  ;;  %v262_v25 = vpop.f32.mrb[1].mxu0  ;;  %v331_v12 = vpop.f32.mrb[0].mxu1  ;;  %v668_v21 = vld [vmem:[#allocation12 + $0x18] sm:$0xff] (%p115_p4) }
 0x14a   : > { %v337_v26 = vadd.f32 %v262_v25, %v127_v22  ;;  %v333_v30 = vpop.f32.mrb[1].mxu1  ;;  %v338_v34 = vadd.f32 %v331_v12, %v128_v32  ;;  %v1327_v22 = vmov (%p115_p4), 0.0   ;;  %v1053_v23 = vpack.c.bf16 (%p115_p4), %v668_v21, %v667_v18  ;;  %v670_v25 = vld [vmem:[#allocation12 + $0x28] sm:$0xff] (%p115_p4)  ;;  %v679_v32 = vld [vmem:[#allocation12 + $0x70] sm:$0xff] (%p115_p4) }
 0x14b   : > { %v797_v27 = vmul.f32 -1.442695, %v336_v24  ;;  %v339_v31 = vadd.f32 %v333_v30, %v129_v29  ;;  %v669_v24 = vld [vmem:[#allocation12 + $0x20] sm:$0xff] (%p115_p4)  ;;  %v678_v30 = vld [vmem:[#allocation12 + $0x68] sm:$0xff] (%p115_p4) }
 0x14c   : > { %v798_v28 = vmul.f32 -1.442695, %v337_v26  ;;  %v1056_v26 = vpack.c.bf16 (%p115_p4), %v670_v25, %v669_v24 }
 0x14d   : > { %1126 = vpow2.f32 %v797_v27  ;;  %v799_v33 = vmul.f32 -1.442695, %v339_v31  ;;  %v671_v27 = vld [vmem:[#allocation12 + $0x30] sm:$0xff] (%p115_p4) }
 0x14e   : > { %1128 = vpow2.f32 %v798_v28  ;;  %v672_v28 = vld [vmem:[#allocation12 + $0x38] sm:$0xff] (%p115_p4) }
 0x14f   : > { %1130 = vpow2.f32 %v799_v33  ;;  %v680_v33 = vld [vmem:[#allocation12 + $0x78] sm:$0xff] (%p115_p4) }
 0x150   : > { %1132 = vtanh.f32 %v338_v34  ;;  %v1071_v34 = vpack.c.bf16 (%p115_p4), %v680_v33, %v679_v32 }
 0x157   : > { %v1127_v35 = vpop.eup %1126 }
 0x158   : > { %v1129_v36 = vpop.eup %1128  ;;  %v343_v37 = vadd.f32 1.0, %v1127_v35  ;;  %v803_v35 = vld [vmem:[%s1513_s5] ss:$0 sm:$0xff] (%p115_p4) }
 0x159   : > { %v349_v38 = vadd.f32 1.0, %v1129_v36  ;;  %v1131_v39 = vpop.eup %1130 }
 0x15a   : > { %1134 = vrcp.f32 %v343_v37  ;;  %v1133_v40 = vpop.eup %1132  ;;  %v356_v42 = vadd.f32 1.0, %v1131_v39 }
 0x15b   : > { %1136 = vrcp.f32 %v349_v38 }
 0x15c   : > { %1138 = vrcp.f32 %v356_v42 }
 0x164   : > { %v1135_v41 = vpop.eup %1134 }
 0x165   : > { %v1137_v43 = vpop.eup %1136  ;;  %v360_v44 = vmul.f32 %v1135_v41, %v1133_v40 }
 0x166   : > { %v359_v14 = vmul.f32 %v1306_v13, %v1137_v43  ;;  %v1139_v45 = vpop.eup %1138 }
 0x168   : > { %v361_v13 = vadd.f32 %v360_v44, %v359_v14  }
 0x16a   : > { %1140 = vtanh.f32 %v361_v13  ;;  %v676_v13 = vld [vmem:[#allocation12 + $0x58] sm:$0xff] (%p115_p4) }
 0x174   : > { %v1141_v46 = vpop.eup %1140 }
 0x175   : > { %v363_v14 = vmul.f32 %v1141_v46, %v1139_v45  }
 0x177   : > { %557 = vmatmul.mubr.f32.vlgmr.msra.gmra.mrb[2].mxu0 %v363_v14  ;;  %628 = vmatmul.mubr.f32.vlgmr.msra.gmra.mrb[2].mxu1 %v363_v14 }
 0x178   :  { %854 = vmatprep.mubr.msk.f32.mxu0 (%p115_p4), %vm1326_vm0, %v1327_v22  ;;  %1051 = vmatpush3.bf16.msra.mxu0 (%p115_p4), %v1050_v20 }
 0x179   :  { %1052 = vmatprep.subr.bf16.mxu0 (%p115_p4), %v1325_v19 }
 0x17c   :  { %1054 = vmatpush3.bf16.msra.mxu0 (%p115_p4), %v1053_v23 }
 0x17d   :  { %1055 = vmatprep.subr.bf16.mxu0 (%p115_p4), %v1325_v19 }
 0x180   :  { %1057 = vmatpush3.bf16.msra.mxu0 (%p115_p4), %v1056_v26 }
 0x181   :  { %1058 = vmatprep.subr.bf16.mxu0 (%p115_p4), %v1325_v19 }
 0x24a   : > { %v558_v47 = vpop.f32.mrb[2].mxu0  ;;  %v629_v48 = vpop.f32.mrb[2].mxu1 }
 0x24b   : > { %v559_v49 = vadd.f32 %v558_v47, %v1438_v7  ;;  %v560_v50 = vpop.f32.mrb[3].mxu0  ;;  %v631_v51 = vpop.f32.mrb[3].mxu1  ;;  %v630_v57 = vadd.f32 %v629_v48, %v1442_v9  ;;  %v1059_v7 = vpack.c.bf16 (%p115_p4), %v672_v28, %v671_v27  ;;  %v674_v9 = vld [vmem:[#allocation12 + $0x48] sm:$0xff] (%p115_p4) }
 0x24c   : > { %v561_v52 = vadd.f32 %v560_v50, %v1440_v8  ;;  %v632_v55 = vadd.f32 %v631_v51, %v1444_v10  ;;  %v673_v8 = vld [vmem:[#allocation12 + $0x40] sm:$0xff] (%p115_p4) }
 0x24d   : > { %v800_v53 = vmul.f32 -1.442695, %v559_v49  ;;  %1060 = vmatpush3.bf16.msra.mxu0 (%p115_p4), %v1059_v7  ;;  %v1062_v10 = vpack.c.bf16 (%p115_p4), %v674_v9, %v673_v8 }
 0x24e   : > { %v801_v54 = vmul.f32 -1.442695, %v561_v52  ;;  %v802_v56 = vmul.f32 -1.442695, %v632_v55  ;;  %1061 = vmatprep.subr.bf16.mxu0 (%p115_p4), %v1325_v19 }
 0x24f   : > { %1142 = vpow2.f32 %v800_v53 }
 0x250   : > { %1144 = vpow2.f32 %v801_v54 }
 0x251   : > { %1146 = vpow2.f32 %v802_v56  ;;  %1063 = vmatpush3.bf16.msra.mxu0 (%p115_p4), %v1062_v10 }
 0x252   : > { %1148 = vtanh.f32 %v630_v57  ;;  %1064 = vmatprep.subr.bf16.mxu0 (%p115_p4), %v1325_v19 }
 0x259   : > { %v1143_v58 = vpop.eup %1142 }
 0x25a   : > { %v1145_v59 = vpop.eup %1144  ;;  %v637_v60 = vadd.f32 1.0, %v1143_v58 }
 0x25b   : > { %v643_v61 = vadd.f32 1.0, %v1145_v59  ;;  %v1147_v62 = vpop.eup %1146 }
 0x25c   : > { %1150 = vrcp.f32 %v637_v60  ;;  %v1149_v63 = vpop.eup %1148  ;;  %v650_v3 = vadd.f32 1.0, %v1147_v62 }
 0x25d   : > { %1152 = vrcp.f32 %v643_v61 }
 0x25e   : > { %1154 = vrcp.f32 %v650_v3 }
 0x266   : > { %v1151_v0 = vpop.eup %1150 }
 0x267   : > { %v1153_v1 = vpop.eup %1152  ;;  %v654_v2 = vmul.f32 %v1151_v0, %v1149_v63 }
 0x268   : > { %v653_v4 = vmul.f32 %v1298_v11, %v1153_v1  ;;  %v1155_v5 = vpop.eup %1154 }
 0x26a   : > { %v655_v11 = vadd.f32 %v654_v2, %v653_v4  }
 0x26c   : > { %1156 = vtanh.f32 %v655_v11  ;;  %v675_v11 = vld [vmem:[#allocation12 + $0x50] sm:$0xff] (%p115_p4) }
 0x26d   :  { %v1065_v29 = vpack.c.bf16 (%p115_p4), %v676_v13, %v675_v11 }
 0x26f   :  { %1066 = vmatpush3.bf16.msra.mxu0 (%p115_p4), %v1065_v29 }
 0x270   :  { %1067 = vmatprep.subr.bf16.mxu0 (%p115_p4), %v1325_v19 }
 0x273   :  { %117 = sbr.rel (!%p115_p4) target bundleno = 81 (0x51), region = 76 }
 0x276   : > { %v1157_v6 = vpop.eup %1156 }
 0x277   : > { %v657_v15 = vmul.f32 %v1157_v6, %v1155_v5  }
 0x279   : > { %v1515_v12 = vmov %v657_v15 }
 0x27a   :  { %v677_v12 = vld [vmem:[#allocation12 + $0x60] sm:$0xff] }
 0x27b   :  { %v1068_v31 = vpack.c.bf16 %v678_v30, %v677_v12 }
 0x27d   :  { %1069 = vmatpush3.bf16.msra.mxu0 %v1068_v31 }
 0x27e   :  { %1070 = vmatprep.subr.bf16.mxu0 %v1325_v19 }
 0x281   :  { %1072 = vmatpush3.bf16.msra.mxu0 %v1071_v34 }
 0x284   :  { %855 = vmatmul.mubr.f32.vlgmr.msra.gmra.mrb[0].mxu0 %v657_v15 }
 0x357   :  { %v754_v36 = vpop.f32.mrb[0].mxu0 }
 0x358   :  { %v755_v37 = vadd.f32 %v803_v35, %v754_v36  ;;  %v856_v38 = vpop.f32.mrb[1].mxu0 }
 0x35a   :  { %758 = vst [vmem:[#allocation14] sm:$0xff] %v755_v37 }
 0x35b   :  { %1257 = shalt.err (!%p1254_p9)
}
 0x35c   :  { %s1258_s8 = scalar_lea.hbm %s1514_s6, 128 }
 0x35d   :  { %p1259_p10 = scmp.ne.s32.totalorder %s1514_s6, %s1258_s8  ;;  %p1262_p11 = scmp.lt.u32.totalorder %s1258_s8, %s1514_s6 }
 0x35f   :  { %p1264_p12 = pnand %p1262_p11, %p1259_p10 }
 0x361   :  { %1267 = shalt.err (!%p1264_p12)
}
 0x362   :  { %768 = dma.vmem_to_hbm [thread:$0]  %s766_s28, 128, %s1514_s6, [#allocation8]  }
 0x363   :  { %1294 = dma.done.wait [#allocation8], 128  }
 0x364   :  { %1295 = vsyncadd [#allocation8], 4294967168 }
 0x365   :  { %772 = vsyncpa [#allocation7], 1 }
 0x366   :  { %773 = vsyncpa [#allocation10], 1 }
 0x367   :  { %774 = vsyncpa [#allocation13], 1 }
 0x368   :  { %775 = vsyncpa [#allocation8], 1 }

</bundles_post_ra>
